<compile_context>
chip_gen: v5e
topology: v5e:2x2
jax: 0.10.0
libtpu: 0.0.40
codegen_flags: <defaults>
</compile_context>

<pallas_src>
import functools

import jax
import jax.numpy as jnp
from jax import lax
from jax.experimental import pallas as pl
from jax.experimental.pallas import tpu as pltpu

_LANE = 128
_SUBLANE = 8


def _cdiv(a, b):
    return -(-a // b)


def _round_up(a, b):
    return _cdiv(a, b) * b


def _default_num_parallel():
    """2 grid slices (one per TensorCore) on TPU7x, 1 on single-TC v5e/v6e."""
    try:
        kind = jax.devices()[0].device_kind.lower()
    except Exception:
        return 1
    return 2 if "7" in kind else 1


def _mse_partial_kernel(s_ref, t_ref, out_ref, acc_ref, *, rows, tile_rows,
                        chunk_rows, n_inner, n_acc, steps_per_core):
    c = pl.program_id(0)          # core / parallel slice
    i = pl.program_id(1)          # reduction step within the slice

    @pl.when(i == 0)
    def _():
        acc_ref[...] = jnp.zeros_like(acc_ref)

    # Logical (unclamped) first row of this tile.  Duplicate steps created by
    # the clamped index_map start at >= rows and are fully masked to zero.
    tile_row0 = (c * steps_per_core + i) * tile_rows

    # Row index within a chunk; hoisted so it is built once per grid step.
    row_in_chunk = lax.broadcasted_iota(jnp.int32, (chunk_rows, _LANE), 0)

    for j in range(n_inner):                      # static trip count
        r0 = j * chunk_rows                       # static chunk offset
        s = s_ref[pl.ds(r0, chunk_rows), :].astype(jnp.float32)
        t = t_ref[pl.ds(r0, chunk_rows), :].astype(jnp.float32)
        d = s - t
        dd = d * d
        # Zero rows past the true extent (ragged last block / duplicate steps).
        # `limit` is a scalar, so this is just one compare + one select per vreg
        # -- far below the VPU budget of this HBM-bound kernel.
        limit = rows - tile_row0 - r0
        dd = jnp.where(row_in_chunk < limit, dd, 0.0)
        # n_acc independent accumulators: the free (row-splitting) reshape keeps
        # everything as pure vreg adds while breaking the serial add chain.
        acc_ref[...] += jnp.sum(
            dd.reshape(chunk_rows // (_SUBLANE * n_acc), n_acc, _SUBLANE, _LANE),
            axis=0)

    @pl.when(i == steps_per_core - 1)
    def _():
        out_ref[...] = jnp.sum(acc_ref[...], axis=0).reshape(1, _SUBLANE, _LANE)


def hint_mse_loss(fm_s, fm_t, *, tile_bytes_per_input=4 * 1024 * 1024,
                  num_parallel=None):
    """mean((fm_s - fm_t)^2) over all elements, for any matching shapes."""
    assert fm_s.shape == fm_t.shape, "F.mse_loss here expects matching shapes"
    total = int(fm_s.size)

    if num_parallel is None:
        num_parallel = _default_num_parallel()

    s_flat = fm_s.reshape(-1)
    t_flat = fm_t.reshape(-1)

    # Lane alignment: only the (rare) sub-128 remainder is padded; identical
    # zero padding on both sides contributes exactly 0 to the sum.
    rem = total % _LANE
    padded_total = total
    if rem:
        # TODO(synk): avoid this one materialized copy for non-128-multiple
        # sizes (e.g. a masked scalar tail); it is rare for feature maps.
        pad = _LANE - rem
        s_flat = jnp.pad(s_flat, (0, pad))
        t_flat = jnp.pad(t_flat, (0, pad))
        padded_total = total + pad

    rows = padded_total // _LANE
    s2 = s_flat.reshape(rows, _LANE)   # metadata-only reshape, no HBM traffic
    t2 = t_flat.reshape(rows, _LANE)

    # Dtype-aware tile sizing: constant per-step DMA byte volume.
    itemsize = max(jnp.dtype(fm_s.dtype).itemsize, jnp.dtype(fm_t.dtype).itemsize)
    base_chunk = 1024
    budget_rows = max(base_chunk,
                      (tile_bytes_per_input // (_LANE * itemsize))
                      // base_chunk * base_chunk)

    if rows >= base_chunk:
        chunk_rows = base_chunk
        tile_rows = min(budget_rows, _round_up(rows, chunk_rows))
    else:
        chunk_rows = _round_up(rows, _SUBLANE)
        tile_rows = chunk_rows
    n_inner = tile_rows // chunk_rows

    n_acc = 8
    while chunk_rows % (_SUBLANE * n_acc) != 0:
        n_acc //= 2

    num_blocks = _cdiv(rows, tile_rows)
    num_parallel = max(1, min(int(num_parallel), num_blocks))
    steps_per_core = _cdiv(num_blocks, num_parallel)
    last_block = num_blocks - 1

    # Clamp to the last valid block so every DMA is in-bounds; the in-kernel
    # row mask (based on the *unclamped* offset) zeroes duplicated work.
    def in_map(c, i):
        return (jnp.minimum(c * steps_per_core + i, last_block), 0)

    kernel = functools.partial(
        _mse_partial_kernel, rows=rows, tile_rows=tile_rows,
        chunk_rows=chunk_rows, n_inner=n_inner, n_acc=n_acc,
        steps_per_core=steps_per_core)

    bytes_accessed = (rows * _LANE * (jnp.dtype(fm_s.dtype).itemsize
                                      + jnp.dtype(fm_t.dtype).itemsize)
                      + num_parallel * _SUBLANE * _LANE * 4)

    partials = pl.pallas_call(
        kernel,
        out_shape=jax.ShapeDtypeStruct((num_parallel, _SUBLANE, _LANE),
                                       jnp.float32),
        grid_spec=pltpu.PrefetchScalarGridSpec(
            num_scalar_prefetch=0,
            grid=(num_parallel, steps_per_core),
            in_specs=[
                pl.BlockSpec((tile_rows, _LANE), in_map),
                pl.BlockSpec((tile_rows, _LANE), in_map),
            ],
            out_specs=pl.BlockSpec((1, _SUBLANE, _LANE), lambda c, i: (c, 0, 0)),
            scratch_shapes=[pltpu.VMEM((n_acc, _SUBLANE, _LANE), jnp.float32)],
        ),
        compiler_params=pltpu.CompilerParams(
            dimension_semantics=("parallel", "arbitrary"),
            vmem_limit_bytes=32 * 1024 * 1024,
        ),
        cost_estimate=pl.CostEstimate(
            flops=3 * total,
            transcendentals=0,
            bytes_accessed=int(bytes_accessed),
        ),
    )(s2, t2)

    # Tiny (<= 2*1024 element) cross-lane reduce + exact 1/count scale.
    return jnp.sum(partials) / total


if __name__ == "__main__":
    key = jax.random.PRNGKey(0)

    def ref_mse(a, b):
        return jnp.mean((a - b) ** 2)

    def run_check(k, shape, **kwargs):
        ks, kt = jax.random.split(k)
        a = jax.random.normal(ks, shape, dtype=jnp.float32)
        b = jax.random.normal(kt, shape, dtype=jnp.float32)
        got = hint_mse_loss(a, b, **kwargs)
        jax.block_until_ready(got)
        want = ref_mse(a, b)
        assert jnp.allclose(got, want, rtol=1e-5, atol=1e-6), (shape, got, want)
        return got

    k0, k1, k2 = jax.random.split(key, 3)
    # Primary small demo: NCHW feature maps as used by FitNets Hint.
    run_check(k0, (2, 4, 16, 16))
    # Ragged total (not a multiple of 1024): exercises the masked-tail path.
    run_check(k1, (2, 8, 7, 7))
    # Multi-block grid + explicit 2-way slice split (exercises the clamped
    # duplicate-step path on any chip; it is a no-op correctness-wise).
    run_check(k2, (2, 48, 64, 64), tile_bytes_per_input=512 * 1024,
              num_parallel=2)

    print("KERNEL_OK")
</pallas_src>

<mosaic_0001>
module attributes {stable_mosaic.version = 11 : i64} {
  func.func @_mse_partial_kernel(%arg0: i32, %arg1: i32, %arg2: memref<16x128xf32, #tpu.memory_space<vmem>>, %arg3: memref<16x128xf32, #tpu.memory_space<vmem>>, %arg4: memref<1x8x128xf32, #tpu.memory_space<vmem>>, %arg5: memref<2x8x128xf32, #tpu.memory_space<vmem>>) attributes {dimension_semantics = [#tpu.dimension_semantics<parallel>, #tpu.dimension_semantics<arbitrary>], iteration_bounds = array<i64: 1, 1>, scalar_prefetch = 0 : i64, scratch_operands = 1 : i64, tpu.core_type = #tpu.core_type<tc>, window_params = [{transform_indices = @transform_0, window_bounds = array<i64: 16, 128>}, {transform_indices = @transform_1, window_bounds = array<i64: 16, 128>}, {transform_indices = @transform_2, window_bounds = array<i64: 1, 8, 128>}]} {
    %c0_i32 = arith.constant 0 : i32
    %0 = arith.cmpi eq, %arg1, %c0_i32 : i32
    %1 = arith.extui %0 : i1 to i32
    %c0_i32_0 = arith.constant 0 : i32
    %2 = arith.cmpi ne, %1, %c0_i32_0 : i32
    scf.if %2 {
      %cst_15 = arith.constant 0.000000e+00 : f32
      %25 = vector.broadcast %cst_15 : f32 to vector<2x8x128xf32>
      %c0_16 = arith.constant 0 : index
      %c0_17 = arith.constant 0 : index
      %c0_18 = arith.constant 0 : index
      %26 = vector.load %arg5[%c0_16, %c0_17, %c0_18] : memref<2x8x128xf32, #tpu.memory_space<vmem>>, vector<2x8x128xf32>
      tpu.vector_store %arg5[%c0_16, %c0_17, %c0_18], %25 {strides = array<i32>} : memref<2x8x128xf32, #tpu.memory_space<vmem>>, vector<2x8x128xf32>,
    } else {
    }
    %c1_i32 = arith.constant 1 : i32
    %3 = arith.muli %arg0, %c1_i32 : i32
    %4 = arith.addi %3, %arg1 : i32
    %c16_i32 = arith.constant 16 : i32
    %5 = arith.muli %4, %c16_i32 : i32
    %6 = tpu.iota {dimensions = array<i32: 0>} : vector<16x128xi32>
    %c0 = arith.constant 0 : index
    %c0_1 = arith.constant 0 : index
    %7 = vector.load %arg2[%c0, %c0_1] : memref<16x128xf32, #tpu.memory_space<vmem>>, vector<16x128xf32>
    %c0_2 = arith.constant 0 : index
    %c0_3 = arith.constant 0 : index
    %8 = vector.load %arg3[%c0_2, %c0_3] : memref<16x128xf32, #tpu.memory_space<vmem>>, vector<16x128xf32>
    %9 = arith.subf %7, %8 : vector<16x128xf32>
    %10 = arith.mulf %9, %9 : vector<16x128xf32>
    %c16_i32_4 = arith.constant 16 : i32
    %11 = arith.subi %c16_i32_4, %5 : i32
    %c0_i32_5 = arith.constant 0 : i32
    %12 = arith.subi %11, %c0_i32_5 : i32
    %13 = vector.broadcast %12 : i32 to vector<16x128xi32>
    %14 = arith.cmpi slt, %6, %13 : vector<16x128xi32>
    %cst = arith.constant 0.000000e+00 : f32
    %15 = vector.broadcast %cst : f32 to vector<16x128xf32>
    %16 = arith.select %14, %10, %15 : vector<16x128xi1>, vector<16x128xf32>
    %c0_6 = arith.constant 0 : index
    %c0_7 = arith.constant 0 : index
    %c0_8 = arith.constant 0 : index
    %17 = vector.load %arg5[%c0_6, %c0_7, %c0_8] : memref<2x8x128xf32, #tpu.memory_space<vmem>>, vector<2x8x128xf32>
    %18 = vector.shape_cast %16 : vector<16x128xf32> to vector<1x2x8x128xf32>
    %cst_9 = arith.constant dense<0.000000e+00> : vector<2x8x128xf32>
    %19 = vector.multi_reduction <add>, %18, %cst_9 [0] : vector<1x2x8x128xf32> to vector<2x8x128xf32>
    %20 = arith.addf %17, %19 : vector<2x8x128xf32>
    %c0_10 = arith.constant 0 : index
    %c0_11 = arith.constant 0 : index
    %c0_12 = arith.constant 0 : index
    %21 = vector.load %arg5[%c0_10, %c0_11, %c0_12] : memref<2x8x128xf32, #tpu.memory_space<vmem>>, vector<2x8x128xf32>
    tpu.vector_store %arg5[%c0_10, %c0_11, %c0_12], %20 {strides = array<i32>} : memref<2x8x128xf32, #tpu.memory_space<vmem>>, vector<2x8x128xf32>,
    %c0_i32_13 = arith.constant 0 : i32
    %22 = arith.cmpi eq, %arg1, %c0_i32_13 : i32
    %23 = arith.extui %22 : i1 to i32
    %c0_i32_14 = arith.constant 0 : i32
    %24 = arith.cmpi ne, %23, %c0_i32_14 : i32
    scf.if %24 {
      %c0_15 = arith.constant 0 : index
      %c0_16 = arith.constant 0 : index
      %c0_17 = arith.constant 0 : index
      %25 = vector.load %arg5[%c0_15, %c0_16, %c0_17] : memref<2x8x128xf32, #tpu.memory_space<vmem>>, vector<2x8x128xf32>
      %cst_18 = arith.constant dense<0.000000e+00> : vector<8x128xf32>
      %26 = vector.multi_reduction <add>, %25, %cst_18 [0] : vector<2x8x128xf32> to vector<8x128xf32>
      %27 = vector.shape_cast %26 : vector<8x128xf32> to vector<1x8x128xf32>
      %c0_19 = arith.constant 0 : index
      %c0_20 = arith.constant 0 : index
      %c0_21 = arith.constant 0 : index
      %28 = vector.load %arg4[%c0_19, %c0_20, %c0_21] : memref<1x8x128xf32, #tpu.memory_space<vmem>>, vector<1x8x128xf32>
      tpu.vector_store %arg4[%c0_19, %c0_20, %c0_21], %27 {strides = array<i32>} : memref<1x8x128xf32, #tpu.memory_space<vmem>>, vector<1x8x128xf32>,
    } else {
    }
    return
  }
  func.func @transform_0(%arg0: i32, %arg1: i32) -> (i32, i32) {
    %c1_i32 = arith.constant 1 : i32
    %0 = arith.muli %arg0, %c1_i32 : i32
    %1 = arith.addi %0, %arg1 : i32
    %c0_i32 = arith.constant 0 : i32
    %2 = arith.minsi %1, %c0_i32 : i32
    %c0_i32_0 = arith.constant 0 : i32
    %c0_i32_1 = arith.constant 0 : i32
    return %2, %c0_i32_0 : i32, i32
  }
  func.func @transform_1(%arg0: i32, %arg1: i32) -> (i32, i32) {
    %c1_i32 = arith.constant 1 : i32
    %0 = arith.muli %arg0, %c1_i32 : i32
    %1 = arith.addi %0, %arg1 : i32
    %c0_i32 = arith.constant 0 : i32
    %2 = arith.minsi %1, %c0_i32 : i32
    %c0_i32_0 = arith.constant 0 : i32
    %c0_i32_1 = arith.constant 0 : i32
    return %2, %c0_i32_0 : i32, i32
  }
  func.func @transform_2(%arg0: i32, %arg1: i32) -> (i32, i32, i32) {
    %c0_i32 = arith.constant 0 : i32
    %c0_i32_0 = arith.constant 0 : i32
    %c0_i32_1 = arith.constant 0 : i32
    return %arg0, %c0_i32, %c0_i32_0 : i32, i32, i32
  }
}

</mosaic_0001>

<bundles_post_ra>
// kernel: tpu_custom_call.1
= control target key start
LH: loop header
LB: loop body
LE: loop exit
PB: predicated region body
PF: predicated region fallthrough
CT: control target
= control target key end

     0   :  { %7 = vsyncpa [#allocation4], 0  ;;  %s238_s0 = inlined_call_operand.hbm [shape: f32[16,128], index: 0, kind: input, shape index: {}]   ;;  %s239_s1 = inlined_call_operand.hbm [shape: f32[16,128], index: 1, kind: input, shape index: {}]   ;;  %s240_s2 = inlined_call_operand.hbm [shape: f32[1,8,128], index: 2, kind: output, shape index: {}]  }
   0x1   :  { %8 = vsyncpa [#allocation7], 0 }
   0x2   :  { %9 = vsyncpa [#allocation5], 0  ;;  %s20_s11 = sshll.u32 %s238_s0, 4  ;;  %s209_s12 = smov [#allocation3]   ;;  %s21_s11 = int_to_ptr.hbm [resolvable:$true] %s20_s11 }
   0x3   :  { %s22_s13 = sshll.u32 %s209_s12, 4  ;;  %s39_s16 = sshll.u32 %s239_s1, 4  ;;  %s23_s13 = int_to_ptr.vmem [resolvable:$true] %s22_s13  ;;  %s40_s16 = int_to_ptr.hbm [resolvable:$true] %s39_s16 }
   0x4   :  { %s210_s17 = smov 128   ;;  %s211_s18 = smov 8  }
   0x5   :  { %28 = dma.hbm_to_vmem [thread:$0]  %s21_s11, 256, %s23_s13, [#allocation4], %s210_s17, %s210_s17, %s211_s18  }
   0x6   :  { %s212_s19 = smov [#allocation6]  }
   0x7   :  { %s41_s20 = sshll.u32 %s212_s19, 4  ;;  %s42_s20 = int_to_ptr.vmem [resolvable:$true] %s41_s20 }
   0x8   :  { %47 = dma.hbm_to_vmem [thread:$0]  %s40_s16, 256, %s42_s20, [#allocation7], %s210_s17, %s210_s17, %s211_s18  }
   0x9   :  { %203 = dma.done.wait [#allocation4], 256  }
   0xa   :  { %204 = vsyncadd [#allocation4], 4294967040 }
   0xb   :  { %205 = dma.done.wait [#allocation7], 256  }
   0xc   :  { %206 = vsyncadd [#allocation7], 4294967040  ;;  %v75_v0 = vld [vmem:[#allocation3] sm:$0xff]  ;;  %v76_v1 = vld [vmem:[#allocation3 + $0x8] sm:$0xff]  ;;  %s213_s0 = smov [#allocation8]   ;;  %s111_s23 = sshll.u32 %s240_s2, 4  ;;  %s112_s23 = int_to_ptr.hbm [resolvable:$true] %s111_s23 }
   0xd   :  { %v77_v2 = vld [vmem:[#allocation6] sm:$0xff]  ;;  %v78_v3 = vld [vmem:[#allocation6 + $0x8] sm:$0xff]  ;;  %s109_s1 = sshll.u32 %s213_s0, 4  ;;  %s110_s1 = int_to_ptr.vmem [resolvable:$true] %s109_s1 }
   0xe   :  { %v79_v4 = vsub.f32 %v75_v0, %v77_v2  ;;  %v80_v5 = vsub.f32 %v76_v1, %v78_v3 }
  0x10   :  { %v81_v6 = vmul.f32 %v79_v4, %v79_v4  ;;  %v82_v7 = vmul.f32 %v80_v5, %v80_v5 }
  0x12   :  { %v102_v8 = vadd.f32 %v82_v7, %v81_v6 }
  0x14   :  { %103 = vst [vmem:[#allocation8] sm:$0xff] %v102_v8 }
  0x15   :  { %114 = dma.vmem_to_hbm [thread:$0]  %s110_s1, 128, %s112_s23, [#allocation5]  }
  0x16   :  { %207 = dma.done.wait [#allocation5], 128  }
  0x17   :  { %208 = vsyncadd [#allocation5], 4294967168 }
  0x18   :  { %119 = vsyncpa [#allocation4], 1 }
  0x19   :  { %120 = vsyncpa [#allocation7], 1 }
  0x1a   :  { %121 = vsyncpa [#allocation5], 1 }

</bundles_post_ra>
